<compile_context>
chip_gen: v7x
topology: tpu7x:2x2x1
jax: 0.10.0
libtpu: 0.0.40
codegen_flags: <defaults>
</compile_context>

<pallas_src>
import functools

import jax
import jax.numpy as jnp
from jax.experimental import pallas as pl
from jax.experimental.pallas import tpu as pltpu


def _temporal_block_kernel(x_ref, w1_ref, b1_ref, w2_ref, b2_ref, wd_ref, bd_ref,
                           o_ref, col1_ref, col2_ref, *,
                           K, dil, pad, L, L1, TB, C_in, C_out, has_downsample):
    """Fused TemporalBlock forward over a tile of TB batch elements.

    Batch is folded into the lane dimension:
      x_ref  : (C_in,  TB*L)   batch b occupies columns [b*L, (b+1)*L)
      o_ref  : (C_out, TB*L)   same column layout
      w1_ref : (C_out, K*C_in)   im2col-flattened conv1 weight (tap-major rows)
      w2_ref : (C_out, K*C_out)  im2col-flattened conv2 weight
      b1/b2/bd_ref : (C_out, 1) float32
      wd_ref : (C_out, C_in)     1x1 downsample weight
      col1_ref: VMEM (K*C_in,  TB*L1)  im2col of circular-padded x
      col2_ref: VMEM (K*C_out, TB*L)   im2col of h1 restricted to the crop window
    """
    cdt = col1_ref.dtype

    # ---- conv1 im2col: circular padding folded in, per batch element --------
    for b in range(TB):
        xb = x_ref[:, b * L:(b + 1) * L]                       # (C_in, L), f32
        if pad > 0:
            xpad = jnp.concatenate([xb[:, L - pad:], xb, xb[:, :pad]], axis=1)
        else:
            xpad = xb                                          # (C_in, L + 2*pad)
        xpad = xpad.astype(cdt)
        for k in range(K):
            col1_ref[k * C_in:(k + 1) * C_in, b * L1:(b + 1) * L1] = \
                xpad[:, k * dil: k * dil + L1]

    # ---- conv1 as one MXU matmul (contraction K*C_in) + bias + ReLU ---------
    acc1 = jnp.dot(w1_ref[...], col1_ref[...],
                   preferred_element_type=jnp.float32)          # (C_out, TB*L1)
    h1 = jnp.maximum(acc1 + b1_ref[...], 0.0)                   # f32
    h1c = h1.astype(cdt)

    # ---- conv2 im2col, restricted to the final crop window ------------------
    # With circular padding and pad >= dil*(K-1), the cropped conv2 output reads
    # only un-wrapped h1 columns:  h1_b[:, off_k + s], off_k = pad - dil*(K-1-k).
    for b in range(TB):
        for k in range(K):
            off = pad - dil * (K - 1 - k)
            col2_ref[k * C_out:(k + 1) * C_out, b * L:(b + 1) * L] = \
                h1c[:, b * L1 + off: b * L1 + off + L]

    # ---- conv2 (crop window only) + bias + ReLU ------------------------------
    acc2 = jnp.dot(w2_ref[...], col2_ref[...],
                   preferred_element_type=jnp.float32)          # (C_out, TB*L)
    out = jnp.maximum(acc2 + b2_ref[...], 0.0)

    # ---- residual path --------------------------------------------------------
    if has_downsample:
        res = jnp.dot(wd_ref[...], x_ref[...].astype(cdt),
                      preferred_element_type=jnp.float32) + bd_ref[...]
    else:
        res = x_ref[...].astype(jnp.float32)

    o_ref[...] = jnp.maximum(out + res, 0.0).astype(o_ref.dtype)


def _pick_batch_tile(N, L, max_lanes=1024):
    """Pick a batch tile TB (divisor of N).  Prefer lane-aligned tiles
    (TB*L % 128 == 0) that still leave >= 2 grid steps (v7x megacore); else the
    largest lane-aligned tile; else the whole batch (block == full array)."""
    aligned = [tb for tb in range(1, N + 1)
               if N % tb == 0 and (tb * L) % 128 == 0 and tb * L <= max_lanes]
    multi = [tb for tb in aligned if N // tb >= 2]
    if multi:
        return max(multi)
    if aligned:
        return max(aligned)
    return N


def temporal_block(x, w1_oik, b1, w2_oik, b2, wd, bd, *,
                   kernel_size, dilation, padding, stride=1,
                   compute_dtype=jnp.bfloat16, batch_tile=None):
    """Fused TemporalBlock forward (inference).

    x: (N, C_in, L).  Weights in PyTorch Conv1d layout:
      w1_oik: (C_out, C_in, K), w2_oik: (C_out, C_out, K), wd: (C_out, C_in),
      biases: (C_out,).  Returns (N, C_out, L).
    """
    assert stride == 1, "TemporalConvNet uses stride=1"
    N, C_in, L = x.shape
    C_out = w1_oik.shape[0]
    K, d, p = kernel_size, dilation, padding
    L1 = L + 2 * p - d * (K - 1)                       # conv1 output length
    assert p <= L, "circular padding requires padding <= sequence length"
    assert p >= d * (K - 1), "crop-window fast path needs padding >= dilation*(K-1)"
    assert L1 >= L
    has_downsample = (C_in != C_out)

    TB = batch_tile if batch_tile is not None else _pick_batch_tile(N, L)
    assert N % TB == 0, "batch tile must divide batch size"

    cdt = jnp.dtype(compute_dtype)
    itm = cdt.itemsize

    # im2col-flattened weights (tap-major rows) in the MXU-native compute dtype;
    # biases stay f32 (added to the f32 accumulator).
    w1f = jnp.transpose(w1_oik, (0, 2, 1)).reshape(C_out, K * C_in).astype(cdt)
    w2f = jnp.transpose(w2_oik, (0, 2, 1)).reshape(C_out, K * C_out).astype(cdt)
    wdf = wd.astype(cdt)
    b1c = b1.reshape(C_out, 1).astype(jnp.float32)
    b2c = b2.reshape(C_out, 1).astype(jnp.float32)
    bdc = bd.reshape(C_out, 1).astype(jnp.float32)

    # Lane-dense slab layout: fold batch into the time/lane axis (plain XLA
    # layout plumbing outside the kernel).
    x_slab = jnp.transpose(x, (1, 0, 2)).reshape(C_in, N * L)

    kernel = functools.partial(
        _temporal_block_kernel, K=K, dil=d, pad=p, L=L, L1=L1, TB=TB,
        C_in=C_in, C_out=C_out, has_downsample=has_downsample)

    # VMEM budget: double-buffered x/out blocks + weights + im2col scratch +
    # headroom for f32 intermediates.
    vmem_est = (2 * (C_in + C_out) * TB * L * 4
                + 2 * (K * C_in + K * C_out + C_in) * C_out * itm + 6 * C_out * 4
                + (K * C_in * TB * L1 + K * C_out * TB * L) * itm
                + 4 * C_out * TB * L1 * 4)
    vmem_limit = int(min(max(4 * vmem_est, 16 * 1024 * 1024), 128 * 1024 * 1024))

    out_slab = pl.pallas_call(
        kernel,
        out_shape=jax.ShapeDtypeStruct((C_out, N * L), x.dtype),
        grid_spec=pltpu.PrefetchScalarGridSpec(
            num_scalar_prefetch=0,
            grid=(N // TB,),
            in_specs=[
                pl.BlockSpec((C_in, TB * L), lambda n: (0, n)),       # x slab
                pl.BlockSpec((C_out, K * C_in), lambda n: (0, 0)),    # w1 (im2col)
                pl.BlockSpec((C_out, 1), lambda n: (0, 0)),           # b1
                pl.BlockSpec((C_out, K * C_out), lambda n: (0, 0)),   # w2 (im2col)
                pl.BlockSpec((C_out, 1), lambda n: (0, 0)),           # b2
                pl.BlockSpec((C_out, C_in), lambda n: (0, 0)),        # downsample w
                pl.BlockSpec((C_out, 1), lambda n: (0, 0)),           # downsample b
            ],
            out_specs=pl.BlockSpec((C_out, TB * L), lambda n: (0, n)),
            scratch_shapes=[
                pltpu.VMEM((K * C_in, TB * L1), cdt),    # conv1 im2col
                pltpu.VMEM((K * C_out, TB * L), cdt),    # conv2 im2col (crop window)
            ],
        ),
        compiler_params=pltpu.CompilerParams(
            dimension_semantics=("parallel",),
            vmem_limit_bytes=vmem_limit),
    )(x_slab, w1f, b1c, w2f, b2c, wdf, bdc)

    return jnp.transpose(out_slab.reshape(C_out, N, L), (1, 0, 2))


def _conv1d_circular_ref(x, w_oik, b, pad, dil):
    """Pure-JAX reference for nn.Conv1d(..., padding=pad, padding_mode='circular')."""
    xp = jnp.pad(x, ((0, 0), (0, 0), (pad, pad)), mode='wrap')
    y = jax.lax.conv_general_dilated(
        xp, w_oik, window_strides=(1,), padding='VALID', rhs_dilation=(dil,),
        dimension_numbers=('NCH', 'OIH', 'NCH'))
    return y + b[None, :, None]


if __name__ == "__main__":
    # Small shapes consistent with the module: n_inputs=4 -> n_outputs=8, L=16.
    # batch=16 so a lane-dense batch tile (TB=8 -> 128 lanes) and a 2-step
    # parallel grid are exercised.
    N, C_in, C_out, L = 16, 4, 8, 16
    K, stride, dilation = 3, 1, 1
    padding = (K - 1) * dilation          # TemporalConvNet convention

    key = jax.random.PRNGKey(0)
    k1, k2, k3, k4, k5, k6, k7 = jax.random.split(key, 7)
    # Deterministic parameter init matching init_weights(): N(0, 0.01) weights.
    w1 = 0.01 * jax.random.normal(k1, (C_out, C_in, K), jnp.float32)   # conv1.weight (O,I,K)
    b1 = 0.02 * jax.random.normal(k2, (C_out,), jnp.float32)
    w2 = 0.01 * jax.random.normal(k3, (C_out, C_out, K), jnp.float32)  # conv2.weight
    b2 = 0.02 * jax.random.normal(k4, (C_out,), jnp.float32)
    wd = 0.01 * jax.random.normal(k5, (C_out, C_in), jnp.float32)      # downsample 1x1
    bd = 0.02 * jax.random.normal(k6, (C_out,), jnp.float32)
    x = jax.random.normal(k7, (N, C_in, L), jnp.float32)

    # Independent pure-JAX reference of the PyTorch forward (eval: dropout = id).
    h1 = jax.nn.relu(_conv1d_circular_ref(x, w1, b1, padding, dilation))
    h2 = jax.nn.relu(_conv1d_circular_ref(h1, w2, b2, padding, dilation))
    idx = (h2.shape[2] - L) // 2
    out_ref = h2[:, :, idx:idx + L]
    res_ref = jnp.einsum('oi,nil->nol', wd, x) + bd[None, :, None]
    y_ref = jax.nn.relu(out_ref + res_ref)

    # 1) f32 matmul operands: tight numerical check.
    y32 = temporal_block(x, w1, b1, w2, b2, wd, bd,
                         kernel_size=K, dilation=dilation, padding=padding,
                         compute_dtype=jnp.float32)
    y32 = jax.block_until_ready(y32)
    assert y32.shape == (N, C_out, L)
    assert jnp.allclose(y32, y_ref, atol=1e-5, rtol=1e-5), "f32 mismatch vs reference"

    # 2) bf16 matmul operands (default, MXU-native) with f32 accumulation: loose check.
    ybf = temporal_block(x, w1, b1, w2, b2, wd, bd,
                         kernel_size=K, dilation=dilation, padding=padding)
    ybf = jax.block_until_ready(ybf)
    assert ybf.shape == (N, C_out, L)
    assert jnp.allclose(ybf, y_ref, atol=2e-3, rtol=2e-2), "bf16 mismatch vs reference"

    print("KERNEL_OK")
</pallas_src>

<mosaic_0001>
module attributes {stable_mosaic.version = 11 : i64} {
  func.func @_temporal_block_kernel(%arg0: i32, %arg1: memref<4x128xf32, #tpu.memory_space<vmem>>, %arg2: memref<8x12xf32, #tpu.memory_space<vmem>>, %arg3: memref<8x1xf32, #tpu.memory_space<vmem>>, %arg4: memref<8x24xf32, #tpu.memory_space<vmem>>, %arg5: memref<8x1xf32, #tpu.memory_space<vmem>>, %arg6: memref<8x4xf32, #tpu.memory_space<vmem>>, %arg7: memref<8x1xf32, #tpu.memory_space<vmem>>, %arg8: memref<8x128xf32, #tpu.memory_space<vmem>>, %arg9: memref<12x144xf32, #tpu.memory_space<vmem>>, %arg10: memref<24x128xf32, #tpu.memory_space<vmem>>) attributes {dimension_semantics = [#tpu.dimension_semantics<parallel>], iteration_bounds = array<i64: 2>, scalar_prefetch = 0 : i64, scratch_operands = 2 : i64, tpu.core_type = #tpu.core_type<tc>, window_params = [{transform_indices = @transform_0, window_bounds = array<i64: 4, 128>}, {pipeline_mode = #tpu.pipeline_mode<synchronous>, transform_indices = @transform_1, window_bounds = array<i64: 8, 12>}, {pipeline_mode = #tpu.pipeline_mode<synchronous>, transform_indices = @transform_2, window_bounds = array<i64: 8, 1>}, {pipeline_mode = #tpu.pipeline_mode<synchronous>, transform_indices = @transform_3, window_bounds = array<i64: 8, 24>}, {pipeline_mode = #tpu.pipeline_mode<synchronous>, transform_indices = @transform_4, window_bounds = array<i64: 8, 1>}, {pipeline_mode = #tpu.pipeline_mode<synchronous>, transform_indices = @transform_5, window_bounds = array<i64: 8, 4>}, {pipeline_mode = #tpu.pipeline_mode<synchronous>, transform_indices = @transform_6, window_bounds = array<i64: 8, 1>}, {transform_indices = @transform_7, window_bounds = array<i64: 8, 128>}]} {
    %c0 = arith.constant 0 : index
    %c0_0 = arith.constant 0 : index
    %0 = vector.load %arg1[%c0, %c0_0] : memref<4x128xf32, #tpu.memory_space<vmem>>, vector<4x16xf32>
    %1 = vector.extract_strided_slice %0 {offsets = [0, 14], sizes = [4, 2], strides = [1, 1]} : vector<4x16xf32> to vector<4x2xf32>
    %2 = vector.extract_strided_slice %0 {offsets = [0, 0], sizes = [4, 2], strides = [1, 1]} : vector<4x16xf32> to vector<4x2xf32>
    %3 = tpu.concatenate %1, %0, %2 in 1 : vector<4x2xf32>, vector<4x16xf32>, vector<4x2xf32> -> vector<4x20xf32>
    %4 = vector.extract_strided_slice %3 {offsets = [0, 0], sizes = [4, 18], strides = [1, 1]} : vector<4x20xf32> to vector<4x18xf32>
    %c0_1 = arith.constant 0 : index
    %c0_2 = arith.constant 0 : index
    %5 = vector.load %arg9[%c0_1, %c0_2] : memref<12x144xf32, #tpu.memory_space<vmem>>, vector<4x18xf32>
    tpu.vector_store %arg9[%c0_1, %c0_2], %4 {strides = array<i32>} : memref<12x144xf32, #tpu.memory_space<vmem>>, vector<4x18xf32>,
    %6 = vector.extract_strided_slice %3 {offsets = [0, 1], sizes = [4, 18], strides = [1, 1]} : vector<4x20xf32> to vector<4x18xf32>
    %c4 = arith.constant 4 : index
    %c0_3 = arith.constant 0 : index
    %7 = vector.load %arg9[%c4, %c0_3] : memref<12x144xf32, #tpu.memory_space<vmem>>, vector<4x18xf32>
    tpu.vector_store %arg9[%c4, %c0_3], %6 {strides = array<i32>} : memref<12x144xf32, #tpu.memory_space<vmem>>, vector<4x18xf32>,
    %8 = vector.extract_strided_slice %3 {offsets = [0, 2], sizes = [4, 18], strides = [1, 1]} : vector<4x20xf32> to vector<4x18xf32>
    %c8 = arith.constant 8 : index
    %c0_4 = arith.constant 0 : index
    %9 = vector.load %arg9[%c8, %c0_4] : memref<12x144xf32, #tpu.memory_space<vmem>>, vector<4x18xf32>
    tpu.vector_store %arg9[%c8, %c0_4], %8 {strides = array<i32>} : memref<12x144xf32, #tpu.memory_space<vmem>>, vector<4x18xf32>,
    %c0_5 = arith.constant 0 : index
    %c16 = arith.constant 16 : index
    %10 = vector.load %arg1[%c0_5, %c16] : memref<4x128xf32, #tpu.memory_space<vmem>>, vector<4x16xf32>
    %11 = vector.extract_strided_slice %10 {offsets = [0, 14], sizes = [4, 2], strides = [1, 1]} : vector<4x16xf32> to vector<4x2xf32>
    %12 = vector.extract_strided_slice %10 {offsets = [0, 0], sizes = [4, 2], strides = [1, 1]} : vector<4x16xf32> to vector<4x2xf32>
    %13 = tpu.concatenate %11, %10, %12 in 1 : vector<4x2xf32>, vector<4x16xf32>, vector<4x2xf32> -> vector<4x20xf32>
    %14 = vector.extract_strided_slice %13 {offsets = [0, 0], sizes = [4, 18], strides = [1, 1]} : vector<4x20xf32> to vector<4x18xf32>
    %c0_6 = arith.constant 0 : index
    %c18 = arith.constant 18 : index
    %15 = vector.load %arg9[%c0_6, %c18] : memref<12x144xf32, #tpu.memory_space<vmem>>, vector<4x18xf32>
    tpu.vector_store %arg9[%c0_6, %c18], %14 {strides = array<i32>} : memref<12x144xf32, #tpu.memory_space<vmem>>, vector<4x18xf32>,
    %16 = vector.extract_strided_slice %13 {offsets = [0, 1], sizes = [4, 18], strides = [1, 1]} : vector<4x20xf32> to vector<4x18xf32>
    %c4_7 = arith.constant 4 : index
    %c18_8 = arith.constant 18 : index
    %17 = vector.load %arg9[%c4_7, %c18_8] : memref<12x144xf32, #tpu.memory_space<vmem>>, vector<4x18xf32>
    tpu.vector_store %arg9[%c4_7, %c18_8], %16 {strides = array<i32>} : memref<12x144xf32, #tpu.memory_space<vmem>>, vector<4x18xf32>,
    %18 = vector.extract_strided_slice %13 {offsets = [0, 2], sizes = [4, 18], strides = [1, 1]} : vector<4x20xf32> to vector<4x18xf32>
    %c8_9 = arith.constant 8 : index
    %c18_10 = arith.constant 18 : index
    %19 = vector.load %arg9[%c8_9, %c18_10] : memref<12x144xf32, #tpu.memory_space<vmem>>, vector<4x18xf32>
    tpu.vector_store %arg9[%c8_9, %c18_10], %18 {strides = array<i32>} : memref<12x144xf32, #tpu.memory_space<vmem>>, vector<4x18xf32>,
    %c0_11 = arith.constant 0 : index
    %c32 = arith.constant 32 : index
    %20 = vector.load %arg1[%c0_11, %c32] : memref<4x128xf32, #tpu.memory_space<vmem>>, vector<4x16xf32>
    %21 = vector.extract_strided_slice %20 {offsets = [0, 14], sizes = [4, 2], strides = [1, 1]} : vector<4x16xf32> to vector<4x2xf32>
    %22 = vector.extract_strided_slice %20 {offsets = [0, 0], sizes = [4, 2], strides = [1, 1]} : vector<4x16xf32> to vector<4x2xf32>
    %23 = tpu.concatenate %21, %20, %22 in 1 : vector<4x2xf32>, vector<4x16xf32>, vector<4x2xf32> -> vector<4x20xf32>
    %24 = vector.extract_strided_slice %23 {offsets = [0, 0], sizes = [4, 18], strides = [1, 1]} : vector<4x20xf32> to vector<4x18xf32>
    %c0_12 = arith.constant 0 : index
    %c36 = arith.constant 36 : index
    %25 = vector.load %arg9[%c0_12, %c36] : memref<12x144xf32, #tpu.memory_space<vmem>>, vector<4x18xf32>
    tpu.vector_store %arg9[%c0_12, %c36], %24 {strides = array<i32>} : memref<12x144xf32, #tpu.memory_space<vmem>>, vector<4x18xf32>,
    %26 = vector.extract_strided_slice %23 {offsets = [0, 1], sizes = [4, 18], strides = [1, 1]} : vector<4x20xf32> to vector<4x18xf32>
    %c4_13 = arith.constant 4 : index
    %c36_14 = arith.constant 36 : index
    %27 = vector.load %arg9[%c4_13, %c36_14] : memref<12x144xf32, #tpu.memory_space<vmem>>, vector<4x18xf32>
    tpu.vector_store %arg9[%c4_13, %c36_14], %26 {strides = array<i32>} : memref<12x144xf32, #tpu.memory_space<vmem>>, vector<4x18xf32>,
    %28 = vector.extract_strided_slice %23 {offsets = [0, 2], sizes = [4, 18], strides = [1, 1]} : vector<4x20xf32> to vector<4x18xf32>
    %c8_15 = arith.constant 8 : index
    %c36_16 = arith.constant 36 : index
    %29 = vector.load %arg9[%c8_15, %c36_16] : memref<12x144xf32, #tpu.memory_space<vmem>>, vector<4x18xf32>
    tpu.vector_store %arg9[%c8_15, %c36_16], %28 {strides = array<i32>} : memref<12x144xf32, #tpu.memory_space<vmem>>, vector<4x18xf32>,
    %c0_17 = arith.constant 0 : index
    %c48 = arith.constant 48 : index
    %30 = vector.load %arg1[%c0_17, %c48] : memref<4x128xf32, #tpu.memory_space<vmem>>, vector<4x16xf32>
    %31 = vector.extract_strided_slice %30 {offsets = [0, 14], sizes = [4, 2], strides = [1, 1]} : vector<4x16xf32> to vector<4x2xf32>
    %32 = vector.extract_strided_slice %30 {offsets = [0, 0], sizes = [4, 2], strides = [1, 1]} : vector<4x16xf32> to vector<4x2xf32>
    %33 = tpu.concatenate %31, %30, %32 in 1 : vector<4x2xf32>, vector<4x16xf32>, vector<4x2xf32> -> vector<4x20xf32>
    %34 = vector.extract_strided_slice %33 {offsets = [0, 0], sizes = [4, 18], strides = [1, 1]} : vector<4x20xf32> to vector<4x18xf32>
    %c0_18 = arith.constant 0 : index
    %c54 = arith.constant 54 : index
    %35 = vector.load %arg9[%c0_18, %c54] : memref<12x144xf32, #tpu.memory_space<vmem>>, vector<4x18xf32>
    tpu.vector_store %arg9[%c0_18, %c54], %34 {strides = array<i32>} : memref<12x144xf32, #tpu.memory_space<vmem>>, vector<4x18xf32>,
    %36 = vector.extract_strided_slice %33 {offsets = [0, 1], sizes = [4, 18], strides = [1, 1]} : vector<4x20xf32> to vector<4x18xf32>
    %c4_19 = arith.constant 4 : index
    %c54_20 = arith.constant 54 : index
    %37 = vector.load %arg9[%c4_19, %c54_20] : memref<12x144xf32, #tpu.memory_space<vmem>>, vector<4x18xf32>
    tpu.vector_store %arg9[%c4_19, %c54_20], %36 {strides = array<i32>} : memref<12x144xf32, #tpu.memory_space<vmem>>, vector<4x18xf32>,
    %38 = vector.extract_strided_slice %33 {offsets = [0, 2], sizes = [4, 18], strides = [1, 1]} : vector<4x20xf32> to vector<4x18xf32>
    %c8_21 = arith.constant 8 : index
    %c54_22 = arith.constant 54 : index
    %39 = vector.load %arg9[%c8_21, %c54_22] : memref<12x144xf32, #tpu.memory_space<vmem>>, vector<4x18xf32>
    tpu.vector_store %arg9[%c8_21, %c54_22], %38 {strides = array<i32>} : memref<12x144xf32, #tpu.memory_space<vmem>>, vector<4x18xf32>,
    %c0_23 = arith.constant 0 : index
    %c64 = arith.constant 64 : index
    %40 = vector.load %arg1[%c0_23, %c64] : memref<4x128xf32, #tpu.memory_space<vmem>>, vector<4x16xf32>
    %41 = vector.extract_strided_slice %40 {offsets = [0, 14], sizes = [4, 2], strides = [1, 1]} : vector<4x16xf32> to vector<4x2xf32>
    %42 = vector.extract_strided_slice %40 {offsets = [0, 0], sizes = [4, 2], strides = [1, 1]} : vector<4x16xf32> to vector<4x2xf32>
    %43 = tpu.concatenate %41, %40, %42 in 1 : vector<4x2xf32>, vector<4x16xf32>, vector<4x2xf32> -> vector<4x20xf32>
    %44 = vector.extract_strided_slice %43 {offsets = [0, 0], sizes = [4, 18], strides = [1, 1]} : vector<4x20xf32> to vector<4x18xf32>
    %c0_24 = arith.constant 0 : index
    %c72 = arith.constant 72 : index
    %45 = vector.load %arg9[%c0_24, %c72] : memref<12x144xf32, #tpu.memory_space<vmem>>, vector<4x18xf32>
    tpu.vector_store %arg9[%c0_24, %c72], %44 {strides = array<i32>} : memref<12x144xf32, #tpu.memory_space<vmem>>, vector<4x18xf32>,
    %46 = vector.extract_strided_slice %43 {offsets = [0, 1], sizes = [4, 18], strides = [1, 1]} : vector<4x20xf32> to vector<4x18xf32>
    %c4_25 = arith.constant 4 : index
    %c72_26 = arith.constant 72 : index
    %47 = vector.load %arg9[%c4_25, %c72_26] : memref<12x144xf32, #tpu.memory_space<vmem>>, vector<4x18xf32>
    tpu.vector_store %arg9[%c4_25, %c72_26], %46 {strides = array<i32>} : memref<12x144xf32, #tpu.memory_space<vmem>>, vector<4x18xf32>,
    %48 = vector.extract_strided_slice %43 {offsets = [0, 2], sizes = [4, 18], strides = [1, 1]} : vector<4x20xf32> to vector<4x18xf32>
    %c8_27 = arith.constant 8 : index
    %c72_28 = arith.constant 72 : index
    %49 = vector.load %arg9[%c8_27, %c72_28] : memref<12x144xf32, #tpu.memory_space<vmem>>, vector<4x18xf32>
    tpu.vector_store %arg9[%c8_27, %c72_28], %48 {strides = array<i32>} : memref<12x144xf32, #tpu.memory_space<vmem>>, vector<4x18xf32>,
    %c0_29 = arith.constant 0 : index
    %c80 = arith.constant 80 : index
    %50 = vector.load %arg1[%c0_29, %c80] : memref<4x128xf32, #tpu.memory_space<vmem>>, vector<4x16xf32>
    %51 = vector.extract_strided_slice %50 {offsets = [0, 14], sizes = [4, 2], strides = [1, 1]} : vector<4x16xf32> to vector<4x2xf32>
    %52 = vector.extract_strided_slice %50 {offsets = [0, 0], sizes = [4, 2], strides = [1, 1]} : vector<4x16xf32> to vector<4x2xf32>
    %53 = tpu.concatenate %51, %50, %52 in 1 : vector<4x2xf32>, vector<4x16xf32>, vector<4x2xf32> -> vector<4x20xf32>
    %54 = vector.extract_strided_slice %53 {offsets = [0, 0], sizes = [4, 18], strides = [1, 1]} : vector<4x20xf32> to vector<4x18xf32>
    %c0_30 = arith.constant 0 : index
    %c90 = arith.constant 90 : index
    %55 = vector.load %arg9[%c0_30, %c90] : memref<12x144xf32, #tpu.memory_space<vmem>>, vector<4x18xf32>
    tpu.vector_store %arg9[%c0_30, %c90], %54 {strides = array<i32>} : memref<12x144xf32, #tpu.memory_space<vmem>>, vector<4x18xf32>,
    %56 = vector.extract_strided_slice %53 {offsets = [0, 1], sizes = [4, 18], strides = [1, 1]} : vector<4x20xf32> to vector<4x18xf32>
    %c4_31 = arith.constant 4 : index
    %c90_32 = arith.constant 90 : index
    %57 = vector.load %arg9[%c4_31, %c90_32] : memref<12x144xf32, #tpu.memory_space<vmem>>, vector<4x18xf32>
    tpu.vector_store %arg9[%c4_31, %c90_32], %56 {strides = array<i32>} : memref<12x144xf32, #tpu.memory_space<vmem>>, vector<4x18xf32>,
    %58 = vector.extract_strided_slice %53 {offsets = [0, 2], sizes = [4, 18], strides = [1, 1]} : vector<4x20xf32> to vector<4x18xf32>
    %c8_33 = arith.constant 8 : index
    %c90_34 = arith.constant 90 : index
    %59 = vector.load %arg9[%c8_33, %c90_34] : memref<12x144xf32, #tpu.memory_space<vmem>>, vector<4x18xf32>
    tpu.vector_store %arg9[%c8_33, %c90_34], %58 {strides = array<i32>} : memref<12x144xf32, #tpu.memory_space<vmem>>, vector<4x18xf32>,
    %c0_35 = arith.constant 0 : index
    %c96 = arith.constant 96 : index
    %60 = vector.load %arg1[%c0_35, %c96] : memref<4x128xf32, #tpu.memory_space<vmem>>, vector<4x16xf32>
    %61 = vector.extract_strided_slice %60 {offsets = [0, 14], sizes = [4, 2], strides = [1, 1]} : vector<4x16xf32> to vector<4x2xf32>
    %62 = vector.extract_strided_slice %60 {offsets = [0, 0], sizes = [4, 2], strides = [1, 1]} : vector<4x16xf32> to vector<4x2xf32>
    %63 = tpu.concatenate %61, %60, %62 in 1 : vector<4x2xf32>, vector<4x16xf32>, vector<4x2xf32> -> vector<4x20xf32>
    %64 = vector.extract_strided_slice %63 {offsets = [0, 0], sizes = [4, 18], strides = [1, 1]} : vector<4x20xf32> to vector<4x18xf32>
    %c0_36 = arith.constant 0 : index
    %c108 = arith.constant 108 : index
    %65 = vector.load %arg9[%c0_36, %c108] : memref<12x144xf32, #tpu.memory_space<vmem>>, vector<4x18xf32>
    tpu.vector_store %arg9[%c0_36, %c108], %64 {strides = array<i32>} : memref<12x144xf32, #tpu.memory_space<vmem>>, vector<4x18xf32>,
    %66 = vector.extract_strided_slice %63 {offsets = [0, 1], sizes = [4, 18], strides = [1, 1]} : vector<4x20xf32> to vector<4x18xf32>
    %c4_37 = arith.constant 4 : index
    %c108_38 = arith.constant 108 : index
    %67 = vector.load %arg9[%c4_37, %c108_38] : memref<12x144xf32, #tpu.memory_space<vmem>>, vector<4x18xf32>
    tpu.vector_store %arg9[%c4_37, %c108_38], %66 {strides = array<i32>} : memref<12x144xf32, #tpu.memory_space<vmem>>, vector<4x18xf32>,
    %68 = vector.extract_strided_slice %63 {offsets = [0, 2], sizes = [4, 18], strides = [1, 1]} : vector<4x20xf32> to vector<4x18xf32>
    %c8_39 = arith.constant 8 : index
    %c108_40 = arith.constant 108 : index
    %69 = vector.load %arg9[%c8_39, %c108_40] : memref<12x144xf32, #tpu.memory_space<vmem>>, vector<4x18xf32>
    tpu.vector_store %arg9[%c8_39, %c108_40], %68 {strides = array<i32>} : memref<12x144xf32, #tpu.memory_space<vmem>>, vector<4x18xf32>,
    %c0_41 = arith.constant 0 : index
    %c112 = arith.constant 112 : index
    %70 = vector.load %arg1[%c0_41, %c112] : memref<4x128xf32, #tpu.memory_space<vmem>>, vector<4x16xf32>
    %71 = vector.extract_strided_slice %70 {offsets = [0, 14], sizes = [4, 2], strides = [1, 1]} : vector<4x16xf32> to vector<4x2xf32>
    %72 = vector.extract_strided_slice %70 {offsets = [0, 0], sizes = [4, 2], strides = [1, 1]} : vector<4x16xf32> to vector<4x2xf32>
    %73 = tpu.concatenate %71, %70, %72 in 1 : vector<4x2xf32>, vector<4x16xf32>, vector<4x2xf32> -> vector<4x20xf32>
    %74 = vector.extract_strided_slice %73 {offsets = [0, 0], sizes = [4, 18], strides = [1, 1]} : vector<4x20xf32> to vector<4x18xf32>
    %c0_42 = arith.constant 0 : index
    %c126 = arith.constant 126 : index
    %75 = vector.load %arg9[%c0_42, %c126] : memref<12x144xf32, #tpu.memory_space<vmem>>, vector<4x18xf32>
    tpu.vector_store %arg9[%c0_42, %c126], %74 {strides = array<i32>} : memref<12x144xf32, #tpu.memory_space<vmem>>, vector<4x18xf32>,
    %76 = vector.extract_strided_slice %73 {offsets = [0, 1], sizes = [4, 18], strides = [1, 1]} : vector<4x20xf32> to vector<4x18xf32>
    %c4_43 = arith.constant 4 : index
    %c126_44 = arith.constant 126 : index
    %77 = vector.load %arg9[%c4_43, %c126_44] : memref<12x144xf32, #tpu.memory_space<vmem>>, vector<4x18xf32>
    tpu.vector_store %arg9[%c4_43, %c126_44], %76 {strides = array<i32>} : memref<12x144xf32, #tpu.memory_space<vmem>>, vector<4x18xf32>,
    %78 = vector.extract_strided_slice %73 {offsets = [0, 2], sizes = [4, 18], strides = [1, 1]} : vector<4x20xf32> to vector<4x18xf32>
    %c8_45 = arith.constant 8 : index
    %c126_46 = arith.constant 126 : index
    %79 = vector.load %arg9[%c8_45, %c126_46] : memref<12x144xf32, #tpu.memory_space<vmem>>, vector<4x18xf32>
    tpu.vector_store %arg9[%c8_45, %c126_46], %78 {strides = array<i32>} : memref<12x144xf32, #tpu.memory_space<vmem>>, vector<4x18xf32>,
    %c0_47 = arith.constant 0 : index
    %c0_48 = arith.constant 0 : index
    %80 = vector.load %arg2[%c0_47, %c0_48] : memref<8x12xf32, #tpu.memory_space<vmem>>, vector<8x12xf32>
    %c0_49 = arith.constant 0 : index
    %c0_50 = arith.constant 0 : index
    %81 = vector.load %arg9[%c0_49, %c0_50] : memref<12x144xf32, #tpu.memory_space<vmem>>, vector<12x144xf32>
    %cst = arith.constant dense<0.000000e+00> : vector<8x144xf32>
    %82 = tpu.matmul %80, %81, %cst {dimension_numbers = #tpu.dot_dimension_numbers<[1], [0], [0], [1], [0, 0, 1, 1], [], []>} : vector<8x12xf32>, vector<12x144xf32>, vector<8x144xf32> -> vector<8x144xf32>
    %c0_51 = arith.constant 0 : index
    %c0_52 = arith.constant 0 : index
    %83 = vector.load %arg3[%c0_51, %c0_52] : memref<8x1xf32, #tpu.memory_space<vmem>>, vector<8x1xf32>
    %84 = vector.broadcast %83 : vector<8x1xf32> to vector<8x144xf32>
    %85 = arith.addf %82, %84 : vector<8x144xf32>
    %cst_53 = arith.constant 0.000000e+00 : f32
    %86 = vector.broadcast %cst_53 : f32 to vector<8x144xf32>
    %87 = arith.maximumf %85, %86 : vector<8x144xf32>
    %88 = vector.extract_strided_slice %87 {offsets = [0, 0], sizes = [8, 16], strides = [1, 1]} : vector<8x144xf32> to vector<8x16xf32>
    %c0_54 = arith.constant 0 : index
    %c0_55 = arith.constant 0 : index
    %89 = vector.load %arg10[%c0_54, %c0_55] : memref<24x128xf32, #tpu.memory_space<vmem>>, vector<8x16xf32>
    tpu.vector_store %arg10[%c0_54, %c0_55], %88 {strides = array<i32>} : memref<24x128xf32, #tpu.memory_space<vmem>>, vector<8x16xf32>,
    %90 = vector.extract_strided_slice %87 {offsets = [0, 1], sizes = [8, 16], strides = [1, 1]} : vector<8x144xf32> to vector<8x16xf32>
    %c8_56 = arith.constant 8 : index
    %c0_57 = arith.constant 0 : index
    %91 = vector.load %arg10[%c8_56, %c0_57] : memref<24x128xf32, #tpu.memory_space<vmem>>, vector<8x16xf32>
    tpu.vector_store %arg10[%c8_56, %c0_57], %90 {strides = array<i32>} : memref<24x128xf32, #tpu.memory_space<vmem>>, vector<8x16xf32>,
    %92 = vector.extract_strided_slice %87 {offsets = [0, 2], sizes = [8, 16], strides = [1, 1]} : vector<8x144xf32> to vector<8x16xf32>
    %c16_58 = arith.constant 16 : index
    %c0_59 = arith.constant 0 : index
    %93 = vector.load %arg10[%c16_58, %c0_59] : memref<24x128xf32, #tpu.memory_space<vmem>>, vector<8x16xf32>
    tpu.vector_store %arg10[%c16_58, %c0_59], %92 {strides = array<i32>} : memref<24x128xf32, #tpu.memory_space<vmem>>, vector<8x16xf32>,
    %94 = vector.extract_strided_slice %87 {offsets = [0, 18], sizes = [8, 16], strides = [1, 1]} : vector<8x144xf32> to vector<8x16xf32>
    %c0_60 = arith.constant 0 : index
    %c16_61 = arith.constant 16 : index
    %95 = vector.load %arg10[%c0_60, %c16_61] : memref<24x128xf32, #tpu.memory_space<vmem>>, vector<8x16xf32>
    tpu.vector_store %arg10[%c0_60, %c16_61], %94 {strides = array<i32>} : memref<24x128xf32, #tpu.memory_space<vmem>>, vector<8x16xf32>,
    %96 = vector.extract_strided_slice %87 {offsets = [0, 19], sizes = [8, 16], strides = [1, 1]} : vector<8x144xf32> to vector<8x16xf32>
    %c8_62 = arith.constant 8 : index
    %c16_63 = arith.constant 16 : index
    %97 = vector.load %arg10[%c8_62, %c16_63] : memref<24x128xf32, #tpu.memory_space<vmem>>, vector<8x16xf32>
    tpu.vector_store %arg10[%c8_62, %c16_63], %96 {strides = array<i32>} : memref<24x128xf32, #tpu.memory_space<vmem>>, vector<8x16xf32>,
    %98 = vector.extract_strided_slice %87 {offsets = [0, 20], sizes = [8, 16], strides = [1, 1]} : vector<8x144xf32> to vector<8x16xf32>
    %c16_64 = arith.constant 16 : index
    %c16_65 = arith.constant 16 : index
    %99 = vector.load %arg10[%c16_64, %c16_65] : memref<24x128xf32, #tpu.memory_space<vmem>>, vector<8x16xf32>
    tpu.vector_store %arg10[%c16_64, %c16_65], %98 {strides = array<i32>} : memref<24x128xf32, #tpu.memory_space<vmem>>, vector<8x16xf32>,
    %100 = vector.extract_strided_slice %87 {offsets = [0, 36], sizes = [8, 16], strides = [1, 1]} : vector<8x144xf32> to vector<8x16xf32>
    %c0_66 = arith.constant 0 : index
    %c32_67 = arith.constant 32 : index
    %101 = vector.load %arg10[%c0_66, %c32_67] : memref<24x128xf32, #tpu.memory_space<vmem>>, vector<8x16xf32>
    tpu.vector_store %arg10[%c0_66, %c32_67], %100 {strides = array<i32>} : memref<24x128xf32, #tpu.memory_space<vmem>>, vector<8x16xf32>,
    %102 = vector.extract_strided_slice %87 {offsets = [0, 37], sizes = [8, 16], strides = [1, 1]} : vector<8x144xf32> to vector<8x16xf32>
    %c8_68 = arith.constant 8 : index
    %c32_69 = arith.constant 32 : index
    %103 = vector.load %arg10[%c8_68, %c32_69] : memref<24x128xf32, #tpu.memory_space<vmem>>, vector<8x16xf32>
    tpu.vector_store %arg10[%c8_68, %c32_69], %102 {strides = array<i32>} : memref<24x128xf32, #tpu.memory_space<vmem>>, vector<8x16xf32>,
    %104 = vector.extract_strided_slice %87 {offsets = [0, 38], sizes = [8, 16], strides = [1, 1]} : vector<8x144xf32> to vector<8x16xf32>
    %c16_70 = arith.constant 16 : index
    %c32_71 = arith.constant 32 : index
    %105 = vector.load %arg10[%c16_70, %c32_71] : memref<24x128xf32, #tpu.memory_space<vmem>>, vector<8x16xf32>
    tpu.vector_store %arg10[%c16_70, %c32_71], %104 {strides = array<i32>} : memref<24x128xf32, #tpu.memory_space<vmem>>, vector<8x16xf32>,
    %106 = vector.extract_strided_slice %87 {offsets = [0, 54], sizes = [8, 16], strides = [1, 1]} : vector<8x144xf32> to vector<8x16xf32>
    %c0_72 = arith.constant 0 : index
    %c48_73 = arith.constant 48 : index
    %107 = vector.load %arg10[%c0_72, %c48_73] : memref<24x128xf32, #tpu.memory_space<vmem>>, vector<8x16xf32>
    tpu.vector_store %arg10[%c0_72, %c48_73], %106 {strides = array<i32>} : memref<24x128xf32, #tpu.memory_space<vmem>>, vector<8x16xf32>,
    %108 = vector.extract_strided_slice %87 {offsets = [0, 55], sizes = [8, 16], strides = [1, 1]} : vector<8x144xf32> to vector<8x16xf32>
    %c8_74 = arith.constant 8 : index
    %c48_75 = arith.constant 48 : index
    %109 = vector.load %arg10[%c8_74, %c48_75] : memref<24x128xf32, #tpu.memory_space<vmem>>, vector<8x16xf32>
    tpu.vector_store %arg10[%c8_74, %c48_75], %108 {strides = array<i32>} : memref<24x128xf32, #tpu.memory_space<vmem>>, vector<8x16xf32>,
    %110 = vector.extract_strided_slice %87 {offsets = [0, 56], sizes = [8, 16], strides = [1, 1]} : vector<8x144xf32> to vector<8x16xf32>
    %c16_76 = arith.constant 16 : index
    %c48_77 = arith.constant 48 : index
    %111 = vector.load %arg10[%c16_76, %c48_77] : memref<24x128xf32, #tpu.memory_space<vmem>>, vector<8x16xf32>
    tpu.vector_store %arg10[%c16_76, %c48_77], %110 {strides = array<i32>} : memref<24x128xf32, #tpu.memory_space<vmem>>, vector<8x16xf32>,
    %112 = vector.extract_strided_slice %87 {offsets = [0, 72], sizes = [8, 16], strides = [1, 1]} : vector<8x144xf32> to vector<8x16xf32>
    %c0_78 = arith.constant 0 : index
    %c64_79 = arith.constant 64 : index
    %113 = vector.load %arg10[%c0_78, %c64_79] : memref<24x128xf32, #tpu.memory_space<vmem>>, vector<8x16xf32>
    tpu.vector_store %arg10[%c0_78, %c64_79], %112 {strides = array<i32>} : memref<24x128xf32, #tpu.memory_space<vmem>>, vector<8x16xf32>,
    %114 = vector.extract_strided_slice %87 {offsets = [0, 73], sizes = [8, 16], strides = [1, 1]} : vector<8x144xf32> to vector<8x16xf32>
    %c8_80 = arith.constant 8 : index
    %c64_81 = arith.constant 64 : index
    %115 = vector.load %arg10[%c8_80, %c64_81] : memref<24x128xf32, #tpu.memory_space<vmem>>, vector<8x16xf32>
    tpu.vector_store %arg10[%c8_80, %c64_81], %114 {strides = array<i32>} : memref<24x128xf32, #tpu.memory_space<vmem>>, vector<8x16xf32>,
    %116 = vector.extract_strided_slice %87 {offsets = [0, 74], sizes = [8, 16], strides = [1, 1]} : vector<8x144xf32> to vector<8x16xf32>
    %c16_82 = arith.constant 16 : index
    %c64_83 = arith.constant 64 : index
    %117 = vector.load %arg10[%c16_82, %c64_83] : memref<24x128xf32, #tpu.memory_space<vmem>>, vector<8x16xf32>
    tpu.vector_store %arg10[%c16_82, %c64_83], %116 {strides = array<i32>} : memref<24x128xf32, #tpu.memory_space<vmem>>, vector<8x16xf32>,
    %118 = vector.extract_strided_slice %87 {offsets = [0, 90], sizes = [8, 16], strides = [1, 1]} : vector<8x144xf32> to vector<8x16xf32>
    %c0_84 = arith.constant 0 : index
    %c80_85 = arith.constant 80 : index
    %119 = vector.load %arg10[%c0_84, %c80_85] : memref<24x128xf32, #tpu.memory_space<vmem>>, vector<8x16xf32>
    tpu.vector_store %arg10[%c0_84, %c80_85], %118 {strides = array<i32>} : memref<24x128xf32, #tpu.memory_space<vmem>>, vector<8x16xf32>,
    %120 = vector.extract_strided_slice %87 {offsets = [0, 91], sizes = [8, 16], strides = [1, 1]} : vector<8x144xf32> to vector<8x16xf32>
    %c8_86 = arith.constant 8 : index
    %c80_87 = arith.constant 80 : index
    %121 = vector.load %arg10[%c8_86, %c80_87] : memref<24x128xf32, #tpu.memory_space<vmem>>, vector<8x16xf32>
    tpu.vector_store %arg10[%c8_86, %c80_87], %120 {strides = array<i32>} : memref<24x128xf32, #tpu.memory_space<vmem>>, vector<8x16xf32>,
    %122 = vector.extract_strided_slice %87 {offsets = [0, 92], sizes = [8, 16], strides = [1, 1]} : vector<8x144xf32> to vector<8x16xf32>
    %c16_88 = arith.constant 16 : index
    %c80_89 = arith.constant 80 : index
    %123 = vector.load %arg10[%c16_88, %c80_89] : memref<24x128xf32, #tpu.memory_space<vmem>>, vector<8x16xf32>
    tpu.vector_store %arg10[%c16_88, %c80_89], %122 {strides = array<i32>} : memref<24x128xf32, #tpu.memory_space<vmem>>, vector<8x16xf32>,
    %124 = vector.extract_strided_slice %87 {offsets = [0, 108], sizes = [8, 16], strides = [1, 1]} : vector<8x144xf32> to vector<8x16xf32>
    %c0_90 = arith.constant 0 : index
    %c96_91 = arith.constant 96 : index
    %125 = vector.load %arg10[%c0_90, %c96_91] : memref<24x128xf32, #tpu.memory_space<vmem>>, vector<8x16xf32>
    tpu.vector_store %arg10[%c0_90, %c96_91], %124 {strides = array<i32>} : memref<24x128xf32, #tpu.memory_space<vmem>>, vector<8x16xf32>,
    %126 = vector.extract_strided_slice %87 {offsets = [0, 109], sizes = [8, 16], strides = [1, 1]} : vector<8x144xf32> to vector<8x16xf32>
    %c8_92 = arith.constant 8 : index
    %c96_93 = arith.constant 96 : index
    %127 = vector.load %arg10[%c8_92, %c96_93] : memref<24x128xf32, #tpu.memory_space<vmem>>, vector<8x16xf32>
    tpu.vector_store %arg10[%c8_92, %c96_93], %126 {strides = array<i32>} : memref<24x128xf32, #tpu.memory_space<vmem>>, vector<8x16xf32>,
    %128 = vector.extract_strided_slice %87 {offsets = [0, 110], sizes = [8, 16], strides = [1, 1]} : vector<8x144xf32> to vector<8x16xf32>
    %c16_94 = arith.constant 16 : index
    %c96_95 = arith.constant 96 : index
    %129 = vector.load %arg10[%c16_94, %c96_95] : memref<24x128xf32, #tpu.memory_space<vmem>>, vector<8x16xf32>
    tpu.vector_store %arg10[%c16_94, %c96_95], %128 {strides = array<i32>} : memref<24x128xf32, #tpu.memory_space<vmem>>, vector<8x16xf32>,
    %130 = vector.extract_strided_slice %87 {offsets = [0, 126], sizes = [8, 16], strides = [1, 1]} : vector<8x144xf32> to vector<8x16xf32>
    %c0_96 = arith.constant 0 : index
    %c112_97 = arith.constant 112 : index
    %131 = vector.load %arg10[%c0_96, %c112_97] : memref<24x128xf32, #tpu.memory_space<vmem>>, vector<8x16xf32>
    tpu.vector_store %arg10[%c0_96, %c112_97], %130 {strides = array<i32>} : memref<24x128xf32, #tpu.memory_space<vmem>>, vector<8x16xf32>,
    %132 = vector.extract_strided_slice %87 {offsets = [0, 127], sizes = [8, 16], strides = [1, 1]} : vector<8x144xf32> to vector<8x16xf32>
    %c8_98 = arith.constant 8 : index
    %c112_99 = arith.constant 112 : index
    %133 = vector.load %arg10[%c8_98, %c112_99] : memref<24x128xf32, #tpu.memory_space<vmem>>, vector<8x16xf32>
    tpu.vector_store %arg10[%c8_98, %c112_99], %132 {strides = array<i32>} : memref<24x128xf32, #tpu.memory_space<vmem>>, vector<8x16xf32>,
    %134 = vector.extract_strided_slice %87 {offsets = [0, 128], sizes = [8, 16], strides = [1, 1]} : vector<8x144xf32> to vector<8x16xf32>
    %c16_100 = arith.constant 16 : index
    %c112_101 = arith.constant 112 : index
    %135 = vector.load %arg10[%c16_100, %c112_101] : memref<24x128xf32, #tpu.memory_space<vmem>>, vector<8x16xf32>
    tpu.vector_store %arg10[%c16_100, %c112_101], %134 {strides = array<i32>} : memref<24x128xf32, #tpu.memory_space<vmem>>, vector<8x16xf32>,
    %c0_102 = arith.constant 0 : index
    %c0_103 = arith.constant 0 : index
    %136 = vector.load %arg4[%c0_102, %c0_103] : memref<8x24xf32, #tpu.memory_space<vmem>>, vector<8x24xf32>
    %c0_104 = arith.constant 0 : index
    %c0_105 = arith.constant 0 : index
    %137 = vector.load %arg10[%c0_104, %c0_105] : memref<24x128xf32, #tpu.memory_space<vmem>>, vector<24x128xf32>
    %cst_106 = arith.constant dense<0.000000e+00> : vector<8x128xf32>
    %138 = tpu.matmul %136, %137, %cst_106 {dimension_numbers = #tpu.dot_dimension_numbers<[1], [0], [0], [1], [0, 0, 1, 1], [], []>} : vector<8x24xf32>, vector<24x128xf32>, vector<8x128xf32> -> vector<8x128xf32>
    %c0_107 = arith.constant 0 : index
    %c0_108 = arith.constant 0 : index
    %139 = vector.load %arg5[%c0_107, %c0_108] : memref<8x1xf32, #tpu.memory_space<vmem>>, vector<8x1xf32>
    %140 = vector.broadcast %139 : vector<8x1xf32> to vector<8x128xf32>
    %141 = arith.addf %138, %140 : vector<8x128xf32>
    %cst_109 = arith.constant 0.000000e+00 : f32
    %142 = vector.broadcast %cst_109 : f32 to vector<8x128xf32>
    %143 = arith.maximumf %141, %142 : vector<8x128xf32>
    %c0_110 = arith.constant 0 : index
    %c0_111 = arith.constant 0 : index
    %144 = vector.load %arg6[%c0_110, %c0_111] : memref<8x4xf32, #tpu.memory_space<vmem>>, vector<8x4xf32>
    %c0_112 = arith.constant 0 : index
    %c0_113 = arith.constant 0 : index
    %145 = vector.load %arg1[%c0_112, %c0_113] : memref<4x128xf32, #tpu.memory_space<vmem>>, vector<4x128xf32>
    %cst_114 = arith.constant dense<0.000000e+00> : vector<8x128xf32>
    %146 = tpu.matmul %144, %145, %cst_114 {dimension_numbers = #tpu.dot_dimension_numbers<[1], [0], [0], [1], [0, 0, 1, 1], [], []>} : vector<8x4xf32>, vector<4x128xf32>, vector<8x128xf32> -> vector<8x128xf32>
    %c0_115 = arith.constant 0 : index
    %c0_116 = arith.constant 0 : index
    %147 = vector.load %arg7[%c0_115, %c0_116] : memref<8x1xf32, #tpu.memory_space<vmem>>, vector<8x1xf32>
    %148 = vector.broadcast %147 : vector<8x1xf32> to vector<8x128xf32>
    %149 = arith.addf %146, %148 : vector<8x128xf32>
    %150 = arith.addf %143, %149 : vector<8x128xf32>
    %cst_117 = arith.constant 0.000000e+00 : f32
    %151 = vector.broadcast %cst_117 : f32 to vector<8x128xf32>
    %152 = arith.maximumf %150, %151 : vector<8x128xf32>
    %c0_118 = arith.constant 0 : index
    %c0_119 = arith.constant 0 : index
    %153 = vector.load %arg8[%c0_118, %c0_119] : memref<8x128xf32, #tpu.memory_space<vmem>>, vector<8x128xf32>
    tpu.vector_store %arg8[%c0_118, %c0_119], %152 {strides = array<i32>} : memref<8x128xf32, #tpu.memory_space<vmem>>, vector<8x128xf32>,
    return
  }
  func.func @transform_0(%arg0: i32) -> (i32, i32) {
    %c0_i32 = arith.constant 0 : i32
    %c0_i32_0 = arith.constant 0 : i32
    return %c0_i32, %arg0 : i32, i32
  }
  func.func @transform_1(%arg0: i32) -> (i32, i32) {
    %c0_i32 = arith.constant 0 : i32
    %c0_i32_0 = arith.constant 0 : i32
    %c0_i32_1 = arith.constant 0 : i32
    return %c0_i32, %c0_i32_0 : i32, i32
  }
  func.func @transform_2(%arg0: i32) -> (i32, i32) {
    %c0_i32 = arith.constant 0 : i32
    %c0_i32_0 = arith.constant 0 : i32
    %c0_i32_1 = arith.constant 0 : i32
    return %c0_i32, %c0_i32_0 : i32, i32
  }
  func.func @transform_3(%arg0: i32) -> (i32, i32) {
    %c0_i32 = arith.constant 0 : i32
    %c0_i32_0 = arith.constant 0 : i32
    %c0_i32_1 = arith.constant 0 : i32
    return %c0_i32, %c0_i32_0 : i32, i32
  }
  func.func @transform_4(%arg0: i32) -> (i32, i32) {
    %c0_i32 = arith.constant 0 : i32
    %c0_i32_0 = arith.constant 0 : i32
    %c0_i32_1 = arith.constant 0 : i32
    return %c0_i32, %c0_i32_0 : i32, i32
  }
  func.func @transform_5(%arg0: i32) -> (i32, i32) {
    %c0_i32 = arith.constant 0 : i32
    %c0_i32_0 = arith.constant 0 : i32
    %c0_i32_1 = arith.constant 0 : i32
    return %c0_i32, %c0_i32_0 : i32, i32
  }
  func.func @transform_6(%arg0: i32) -> (i32, i32) {
    %c0_i32 = arith.constant 0 : i32
    %c0_i32_0 = arith.constant 0 : i32
    %c0_i32_1 = arith.constant 0 : i32
    return %c0_i32, %c0_i32_0 : i32, i32
  }
  func.func @transform_7(%arg0: i32) -> (i32, i32) {
    %c0_i32 = arith.constant 0 : i32
    %c0_i32_0 = arith.constant 0 : i32
    return %c0_i32, %arg0 : i32, i32
  }
}

</mosaic_0001>

<bundles_post_ra>
// kernel: tpu_custom_call.1
= control target key start
LH: loop header
LB: loop body
LE: loop exit
PB: predicated region body
PF: predicated region fallthrough
CT: control target
= control target key end

     0   :  { %12 = vsyncpa [#allocation5], 0  ;;  %s1409_s0 = inlined_call_operand.vmem [shape: f32[4,256], index: 0, kind: input, shape index: {}]   ;;  %s1410_s1 = inlined_call_operand.vmem [shape: f32[8,12], index: 1, kind: input, shape index: {}]   ;;  %s1411_s2 = inlined_call_operand.vmem [shape: f32[8,1], index: 2, kind: input, shape index: {}]   ;;  %s1412_s3 = inlined_call_operand.vmem [shape: f32[8,24], index: 3, kind: input, shape index: {}]   ;;  %s1413_s4 = inlined_call_operand.vmem [shape: f32[8,1], index: 4, kind: input, shape index: {}]   ;;  %s1414_s5 = inlined_call_operand.vmem [shape: f32[8,4], index: 5, kind: input, shape index: {}]   ;;  %s1415_s6 = inlined_call_operand.vmem [shape: f32[8,1], index: 6, kind: input, shape index: {}]   ;;  %s1416_s7 = inlined_call_operand.hbm [shape: f32[8,256], index: 7, kind: output, shape index: {}]  }
   0x1   :  { %14 = vsyncpa [#allocation5 + $0x1], 0  ;;  %s1221_s24 = smov 0   ;;  %s1223_s25 = smov 0  }
   0x2   :  { %s1225_s26 = smov 0   ;;  %s1227_s27 = smov 0  }
   0x3 LB: > { %s1242_s28 = sadd.s32 4294967295, %s1134_s27   ;;  %s942_s29 = sadd.s32 4294967294, %s1134_s27   ;;  %s1134_s27 = sphi %s1227_s27, %s1422_s27   ;;  %s1130_s26 = sphi %s1225_s26, %s1421_s26   ;;  %s1126_s25 = sphi %s1223_s25, %s1420_s25   ;;  %s1122_s24 = sphi %s1221_s24, %s1419_s24  }
   0x4   : > { %s1246_s30 = sadd.s32 1, %s1134_s27   ;;  %s179_s8 = sadd.s32 1, %s1130_s26 }
   0x5   : > { %s176_s9 = ssub.s32 %s1134_s27, %s1246_s30  ;;  %p189_p0 = scmp.ne.s32.totalorder %s1130_s26, %s1126_s25 }
   0x6   : > { %p177_p1 = scmp.eq.s32.totalorder %s176_s9, 0  ;;  %p190_p2 = scmp.eq.s32.totalorder %s1242_s28, 1 }
   0x7   : > { %p195_p3 = scmp.ne.s32.totalorder %s1126_s25, %s1122_s24  ;;  %p196_p4 = scmp.eq.s32.totalorder %s942_s29, 1 }
   0x8   : > { %s1257_s10 = scalar_select %p177_p1, %s1130_s26, %s179_s8  }
   0x9   : > { %p1259_p5 = por %p190_p2, %p189_p0  ;;  %p1263_p6 = por %p196_p4, %p195_p3 }
   0xa   : > { %p945_p7 = scmp.ge.s32.totalorder %s1134_s27, 1  ;;  %p239_p8 = scmp.lt.s32.totalorder %s1134_s27, 3 }
   0xc   : > { %p240_p9 = pnand %p945_p7, %p239_p8 }
   0xd   : > { %p270_p10 = scmp.lt.s32.totalorder (!%p240_p9), %s1242_s28, 1  ;;  %s1136_s18 = smov (!%p240_p9), 18   ;;  %vm285_vm0 = vcmask (!%p240_p9), 15360   ;;  %vm287_vm1 = vcmask (!%p240_p9), 146432   ;;  %vm289_vm2 = vcmask (!%p240_p9), 142336   ;;  %v1162_v56 = vmov (!%p240_p9), 0.0  }
   0xe   : > { %243 = sbr.rel (%p240_p9) target bundleno = 951 (0x3b7), region = 48  ;;  %s1137_s19 = smov (!%p240_p9), 114   ;;  %596 = vmatprep.mubr.f32.mxu0 (!%p240_p9), %v1162_v56  ;;  %v515_v57 = vld [vmem:[%s1411_s2] sm:$0xff] (!%p240_p9)  ;;  %v1165_v58 = vmov (!%p240_p9), 0   ;;  %vm1166_vm3 = vmmov (!%p240_p9), 0   ;;  %vm319_vm4 = vcmask (!%p240_p9), 289936  }
   0xf   : > { %s1138_s20 = smov (!%p240_p9), 98   ;;  %s1139_s21 = smov (!%p240_p9), 2   ;;  %1070 = vset.pattern.permute.xlu1 (!%p240_p9), %v1165_v58  ;;  %1071 = vset.pattern.permute.xlu0 (!%p240_p9), %v1165_v58  ;;  %vm348_vm5 = vcmask (!%p240_p9), 437536   ;;  %vm377_vm6 = vcmask (!%p240_p9), 585136   ;;  %vm406_vm7 = vcmask (!%p240_p9), 732736   ;;  %vm435_vm8 = vcmask (!%p240_p9), 880336  }
  0x10   : > { %s1140_s22 = smov (!%p240_p9), 82   ;;  %s1141_s23 = smov (!%p240_p9), 66   ;;  %970 = vmatprep.mubr.msk.f32.mxu1 (!%p240_p9), %vm1166_vm3, %v1162_v56  ;;  %vm464_vm9 = vcmask (!%p240_p9), 1027936   ;;  %vm495_vm10 = vcmask (!%p240_p9), 125952   ;;  %vm493_vm11 = vcmask (!%p240_p9), 1044464   ;;  %vm296_vm12 = vcmask (!%p240_p9), 146436  }
  0x11   : > { %s1142_s29 = smov (!%p240_p9), 50   ;;  %s1143_s8 = smov (!%p240_p9), 34   ;;  %vm325_vm13 = vcmask (!%p240_p9), 294036   ;;  %vm354_vm14 = vcmask (!%p240_p9), 441636   ;;  %vm383_vm15 = vcmask (!%p240_p9), 589236  }
  0x12   : > { %s1144_s9 = smov (!%p240_p9), 126   ;;  %s1147_s15 = smov (!%p240_p9), 54  }
  0x13   : > { %s1148_s16 = smov (!%p240_p9), 52  }
  0x15   : > { %s271_s13 = scalar_select %p270_p10, %s1242_s28, 1 }
  0x17   : > { %s947_s14 = sshll.u32 %s271_s13, 2  ;;  %s1145_s13 = smov 16  }
  0x18   : > { %s1274_s17 = scalar_lea.vmem %s1409_s0, %s947_s14  ;;  %s1146_s14 = smov 36  }
  0x19   : > { %v274_v0 = vld [vmem:[%s1274_s17] sm:$0xf] }
  0x1a   : > { %282 = vrot.lane.b32.xlu1 %v274_v0, %s1136_s18  ;;  %276 = vrot.lane.b32.xlu0 %v274_v0, %s1137_s19  ;;  %v302_v1 = vld [vmem:[%s1274_s17] sm:$0xf] }
  0x1b   : > { %v331_v2 = vld [vmem:[%s1274_s17] sm:$0xf] }
  0x1c   : > { %v360_v3 = vld [vmem:[%s1274_s17] sm:$0xf] }
  0x1d   : > { %v389_v4 = vld [vmem:[%s1274_s17] sm:$0xf] }
  0x1e   : > { %304 = vrot.lane.b32.xlu1 %v302_v1, %s1138_s20  ;;  %279 = vrot.lane.b32.xlu0 %v274_v0, %s1139_s21  ;;  %v418_v5 = vld [vmem:[%s1274_s17] sm:$0xf] }
  0x1f   : > { %v447_v6 = vld [vmem:[%s1274_s17] sm:$0xf] }
  0x20   : > { %v476_v7 = vld [vmem:[%s1274_s17] sm:$0xf] }
  0x22   : > { %310 = vrot.lane.b32.xlu1 %v302_v1, %s1139_s21  ;;  %307 = vrot.lane.b32.xlu0 %v302_v1, %s1137_s19 }
  0x26   : > { %336 = vrot.lane.b32.xlu1 %v331_v2, %s1138_s20  ;;  %333 = vrot.lane.b32.xlu0 %v331_v2, %s1140_s22 }
  0x2a   : > { %362 = vrot.lane.b32.xlu1 %v360_v3, %s1141_s23  ;;  %339 = vrot.lane.b32.xlu0 %v331_v2, %s1137_s19 }
  0x2e   : > { %368 = vrot.lane.b32.xlu1 %v360_v3, %s1138_s20  ;;  %365 = vrot.lane.b32.xlu0 %v360_v3, %s1140_s22  ;;  %s1150_s20 = smov 70  }
  0x32   : > { %394 = vrot.lane.b32.xlu1 %v389_v4, %s1141_s23  ;;  %391 = vrot.lane.b32.xlu0 %v389_v4, %s1142_s29 }
  0x36   : > { %420 = vrot.lane.b32.xlu1 %v418_v5, %s1143_s8  ;;  %397 = vrot.lane.b32.xlu0 %v389_v4, %s1140_s22  ;;  %s1152_s22 = smov 88  }
  0x3a   : > { %426 = vrot.lane.b32.xlu1 %v418_v5, %s1141_s23  ;;  %423 = vrot.lane.b32.xlu0 %v418_v5, %s1142_s29  ;;  %s1153_s23 = smov 108  }
  0x3e   : > { %452 = vrot.lane.b32.xlu1 %v447_v6, %s1143_s8  ;;  %449 = vrot.lane.b32.xlu0 %v447_v6, %s1136_s18 }
  0x42   : > { %481 = vrot.lane.b32.xlu1 %v476_v7, %s1136_s18  ;;  %478 = vrot.lane.b32.xlu0 %v476_v7, %s1139_s21  ;;  %s1151_s21 = smov 90  }
  0x46   : > { %484 = vrot.lane.b32.xlu1 %v476_v7, %s1143_s8  ;;  %455 = vrot.lane.b32.xlu0 %v447_v6, %s1142_s29  ;;  %s1154_s29 = smov 127  }
  0x8c   : > { %v283_v8 = vpop.permute.xlu1 %282  ;;  %v277_v9 = vpop.permute.xlu0 %276 }
  0x90   : > { %v305_v10 = vpop.permute.xlu1 %304  ;;  %v280_v11 = vpop.permute.xlu0 %279 }
  0x91   : > { %v286_v12 = vsel %vm285_vm0, %v277_v9, %v280_v11 }
  0x92   : > { %v288_v13 = vsel %vm287_vm1, %v286_v12, %v283_v8 }
  0x93   : > { %298 = vrot.lane.b32.xlu1 %v288_v13, %s1144_s9  ;;  %290 = vst.msk [vmem:[#allocation2] sm:$0xf] %vm289_vm2, %v288_v13  ;;  %v292_v48 = vrot.slane %v288_v13, 4 }
  0x94   : > { %v311_v14 = vpop.permute.xlu1 %310  ;;  %v308_v15 = vpop.permute.xlu0 %307 }
  0x95   : > { %v313_v16 = vsel %vm285_vm0, %v305_v10, %v308_v15 }
  0x96   : > { %v314_v17 = vsel %vm287_vm1, %v313_v16, %v311_v14 }
  0x97   : > { %316 = vrot.lane.b32.xlu0 %v314_v17, %s1136_s18  ;;  %s1149_s18 = smov 72   ;;  %v321_v50 = vrot.slane %v314_v17, 4 }
  0x98   : > { %v337_v18 = vpop.permute.xlu1 %336  ;;  %v334_v19 = vpop.permute.xlu0 %333 }
  0x99   : > { %v342_v20 = vsel %vm285_vm0, %v334_v19, %v337_v18 }
  0x9b   : > { %327 = vrot.lane.b32.xlu0 %v314_v17, %s1145_s13  ;;  %s1156_s13 = smov 35  }
  0x9c   : > { %v363_v21 = vpop.permute.xlu1 %362  ;;  %v340_v22 = vpop.permute.xlu0 %339 }
  0x9d   : > { %v343_v23 = vsel %vm287_vm1, %v342_v20, %v340_v22 }
  0x9e   : > { %345 = vrot.lane.b32.xlu1 %v343_v23, %s1146_s14  ;;  %v350_v49 = vrot.slane %v343_v23, 4  ;;  %s1157_s14 = smov 17  }
  0xa0   : > { %v369_v24 = vpop.permute.xlu1 %368  ;;  %v366_v25 = vpop.permute.xlu0 %365 }
  0xa1   : > { %v371_v26 = vsel %vm285_vm0, %v363_v21, %v366_v25  ;;  %v782_v25 = vld [vmem:[%s1274_s17] sm:$0xf]  ;;  %s1168_s17 = smov 122  }
  0xa2   : > { %356 = vrot.lane.b32.xlu1 %v343_v23, %s1143_s8  ;;  %v372_v27 = vsel %vm287_vm1, %v371_v26, %v369_v24  ;;  %s1155_s8 = smov 106   ;;  %v510_v24 = vld [vmem:[%s1410_s1] sm:$0xff] }
  0xa3   : > { %374 = vrot.lane.b32.xlu0 %v372_v27, %s1147_s15  ;;  %v379_v52 = vrot.slane %v372_v27, 4  ;;  %s1158_s15 = smov 71   ;;  %v781_v26 = vld [vmem:[%s1414_s5] sm:$0xff] }
  0xa4   : > { %v395_v28 = vpop.permute.xlu1 %394  ;;  %v392_v29 = vpop.permute.xlu0 %391 }
  0xa5   : > { %v400_v30 = vsel %vm285_vm0, %v392_v29, %v395_v28 }
  0xa7   : > { %385 = vrot.lane.b32.xlu0 %v372_v27, %s1148_s16  ;;  %s1159_s16 = smov 53  }
  0xa8   : > { %v421_v31 = vpop.permute.xlu1 %420  ;;  %v398_v32 = vpop.permute.xlu0 %397 }
  0xa9   : > { %v401_v33 = vsel %vm287_vm1, %v400_v30, %v398_v32  ;;  %v1176_v32 = vmov 0.0|0.0  }
  0xaa   : > { %403 = vrot.lane.b32.xlu1 %v401_v33, %s1149_s18  ;;  %v408_v51 = vrot.slane %v401_v33, 4  ;;  %s1160_s18 = smov 89   ;;  %984 = vmatprep.subr.bf16.mxu1 %v1176_v32 }
  0xac   : > { %v427_v34 = vpop.permute.xlu1 %426  ;;  %v424_v35 = vpop.permute.xlu0 %423 }
  0xad   : > { %v429_v36 = vsel %vm285_vm0, %v421_v31, %v424_v35  ;;  %v783_v35 = vld [vmem:[%s1415_s6] sm:$0xff] }
  0xae   : > { %414 = vrot.lane.b32.xlu1 %v401_v33, %s1150_s20  ;;  %v430_v37 = vsel %vm287_vm1, %v429_v36, %v427_v34  ;;  %s1161_s20 = smov 107  }
  0xaf   : > { %432 = vrot.lane.b32.xlu0 %v430_v37, %s1151_s21  ;;  %v437_v53 = vrot.slane %v430_v37, 4  ;;  %s1163_s21 = smov 125  }
  0xb0   : > { %v453_v38 = vpop.permute.xlu1 %452  ;;  %v450_v39 = vpop.permute.xlu0 %449 }
  0xb1   : > { %v458_v42 = vsel %vm285_vm0, %v450_v39, %v453_v38  ;;  %v700_v38 = vld [vmem:[%s1413_s4] sm:$0xff] }
  0xb3   : > { %443 = vrot.lane.b32.xlu0 %v430_v37, %s1152_s22  ;;  %s1164_s22 = smov 124  }
  0xb4   : > { %v482_v40 = vpop.permute.xlu1 %481  ;;  %v479_v41 = vpop.permute.xlu0 %478 }
  0xb5   : > { %v487_v43 = vsel %vm285_vm0, %v479_v41, %v482_v40  ;;  %vm412_vm0 = vcmask 736836  }
  0xb8   : > { %v485_v44 = vpop.permute.xlu1 %484  ;;  %v456_v45 = vpop.permute.xlu0 %455 }
  0xb9   : > { %v488_v46 = vsel %vm287_vm1, %v487_v43, %v485_v44  ;;  %v459_v47 = vsel %vm287_vm1, %v458_v42, %v456_v45  ;;  %vm441_vm1 = vcmask 884436  }
  0xba   : > { %490 = vrot.lane.b32.xlu0 %v488_v46, %s1144_s9  ;;  %461 = vrot.lane.b32.xlu1 %v459_v47, %s1153_s23  ;;  %v466_v54 = vrot.slane %v459_v47, 4  ;;  %v497_v55 = vrot.slane %v488_v46, 4  ;;  %s1171_s23 = smov 121  }
  0xbe   : > { %293 = vrot.lane.b32.xlu0 %v292_v48, %s1154_s29  ;;  %472 = vrot.lane.b32.xlu1 %v459_v47, %s1155_s8  ;;  %s1172_s8 = smov 118  }
  0xc2   : > { %351 = vrot.lane.b32.xlu0 %v350_v49, %s1156_s13  ;;  %322 = vrot.lane.b32.xlu1 %v321_v50, %s1157_s14  ;;  %s1173_s13 = smov 119   ;;  %s1179_s14 = smov 112  }
  0xc6   : > { %409 = vrot.lane.b32.xlu0 %v408_v51, %s1158_s15  ;;  %380 = vrot.lane.b32.xlu1 %v379_v52, %s1159_s16 }
  0xca   : > { %438 = vrot.lane.b32.xlu1 %v437_v53, %s1160_s18  ;;  %467 = vrot.lane.b32.xlu0 %v466_v54, %s1161_s20  ;;  %s1169_s18 = smov 123   ;;  %s1170_s20 = smov 120  }
  0xce   : > { %498 = vrot.lane.b32.xlu1 %v497_v55, %s1163_s21  ;;  %505 = vrot.lane.b32.xlu0 %v488_v46, %s1164_s22 }
  0xd2   : > { %518 = vperm.xlu1 %1070, %v515_v57  }
 0x105   : > { %v299_v59 = vpop.permute.xlu1 %298 }
 0x106   : > { %301 = vst.msk [vmem:[#allocation2 + $0x10] sm:$0xf] %vm289_vm2, %v299_v59  ;;  %vm470_vm2 = vcmask 1032036  }
 0x109   : > { %v317_v60 = vpop.permute.xlu0 %316 }
 0x10a   : > { %320 = vst.msk [vmem:[#allocation2] sm:$0xf] %vm319_vm4, %v317_v60 }
 0x10d   : > { %v328_v61 = vpop.permute.xlu0 %327 }
 0x10e   : > { %330 = vst.msk [vmem:[#allocation2 + $0x10] sm:$0xf] %vm319_vm4, %v328_v61  ;;  %vm501_vm4 = vcmask 1048564  }
 0x110   : > { %v346_v62 = vpop.permute.xlu1 %345 }
 0x111   : > { %349 = vst.msk [vmem:[#allocation2] sm:$0xf] %vm348_vm5, %v346_v62 }
 0x114   : > { %v357_v63 = vpop.permute.xlu1 %356 }
 0x115   : > { %359 = vst.msk [vmem:[#allocation2 + $0x10] sm:$0xf] %vm348_vm5, %v357_v63  ;;  %v375_v0 = vpop.permute.xlu0 %374  ;;  %vm503_vm5 = vcmask 130052   ;;  %v696_v63 = vld [vmem:[%s1412_s3] sm:$0xff] }
 0x116   : > { %378 = vst.msk [vmem:[#allocation2] sm:$0xf] %vm377_vm6, %v375_v0 }
 0x119   : > { %v386_v1 = vpop.permute.xlu0 %385 }
 0x11a   : > { %388 = vst.msk [vmem:[#allocation2 + $0x10] sm:$0xf] %vm377_vm6, %v386_v1  ;;  %vm525_vm6 = vcmask 1043456  }
 0x11c   : > { %v404_v2 = vpop.permute.xlu1 %403 }
 0x11d   : > { %407 = vst.msk [vmem:[#allocation2] sm:$0xf] %vm406_vm7, %v404_v2 }
 0x120   : > { %v415_v3 = vpop.permute.xlu1 %414 }
 0x121   : > { %417 = vst.msk [vmem:[#allocation2 + $0x10] sm:$0xf] %vm406_vm7, %v415_v3  ;;  %v433_v4 = vpop.permute.xlu0 %432  ;;  %vm1167_vm7 = vmmov 1  }
 0x122   : > { %436 = vst.msk [vmem:[#allocation2] sm:$0xf] %vm435_vm8, %v433_v4 }
 0x125   : > { %v444_v5 = vpop.permute.xlu0 %443 }
 0x126   : > { %446 = vst.msk [vmem:[#allocation2 + $0x10] sm:$0xf] %vm435_vm8, %v444_v5  ;;  %vm979_vm8 = vmpackc.low %vm525_vm6, %vm1167_vm7 }
 0x12c   : > { %v462_v6 = vpop.permute.xlu1 %461  ;;  %v491_v7 = vpop.permute.xlu0 %490 }
 0x12d   : > { %465 = vst.msk [vmem:[#allocation2] sm:$0xf] %vm464_vm9, %v462_v6 }
 0x12e   : > { %496 = vst.msk [vmem:[#allocation2 + $0x8] sm:$0xf] %vm495_vm10, %v491_v7 }
 0x12f   : > { %494 = vst.msk [vmem:[#allocation2] sm:$0xf] %vm493_vm11, %v491_v7 }
 0x130   : > { %v473_v8 = vpop.permute.xlu1 %472  ;;  %v294_v9 = vpop.permute.xlu0 %293 }
 0x131   : > { %475 = vst.msk [vmem:[#allocation2 + $0x10] sm:$0xf] %vm464_vm9, %v473_v8  ;;  %vm521_vm9 = vcmask 97280  }
 0x132   : > { %297 = vst.msk [vmem:[#allocation2] sm:$0xf0] %vm296_vm12, %v294_v9  ;;  %vm626_vm12 = vcmask 392448  }
 0x134   : > { %v323_v10 = vpop.permute.xlu1 %322  ;;  %v352_v11 = vpop.permute.xlu0 %351 }
 0x135   : > { %326 = vst.msk [vmem:[#allocation2] sm:$0xf0] %vm325_vm13, %v323_v10  ;;  %vm636_vm13 = vcmask 523648  }
 0x136   : > { %355 = vst.msk [vmem:[#allocation2] sm:$0xf0] %vm354_vm14, %v352_v11  ;;  %vm646_vm14 = vcmask 654848  }
 0x138   : > { %v381_v12 = vpop.permute.xlu1 %380  ;;  %v410_v13 = vpop.permute.xlu0 %409 }
 0x139   : > { %384 = vst.msk [vmem:[#allocation2] sm:$0xf0] %vm383_vm15, %v381_v12  ;;  %vm656_vm15 = vcmask 786048  }
 0x13a   : > { %413 = vst.msk [vmem:[#allocation2] sm:$0xf0] %vm412_vm0, %v410_v13  ;;  %vm666_vm0 = vcmask 917248  }
 0x13c   : > { %v439_v14 = vpop.permute.xlu1 %438  ;;  %v468_v15 = vpop.permute.xlu0 %467 }
 0x13d   : > { %442 = vst.msk [vmem:[#allocation2] sm:$0xf0] %vm441_vm1, %v439_v14  ;;  %vm679_vm1 = vcmask 932864  }
 0x13e   : > { %471 = vst.msk [vmem:[#allocation2] sm:$0xf0] %vm470_vm2, %v468_v15  ;;  %vm682_vm2 = vcmask 1048448  }
 0x140   : > { %v499_v16 = vpop.permute.xlu1 %498  ;;  %v506_v17 = vpop.permute.xlu0 %505 }
 0x141   : > { %502 = vst.msk [vmem:[#allocation2] sm:$0xf0] %vm501_vm4, %v499_v16  ;;  %vm688_vm4 = vcmask 924672  }
 0x142   : > { %504 = vst.msk [vmem:[#allocation2 + $0x8] sm:$0xf0] %vm503_vm5, %v499_v16  ;;  %vm706_vm5 = vcmask 195584  }
 0x143   : > { %508 = vst.msk [vmem:[#allocation2 + $0x10] sm:$0xf] %vm493_vm11, %v506_v17  ;;  %vm605_vm11 = vcmask 130048  }
 0x144   : > { %509 = vst.msk [vmem:[#allocation2 + $0x18] sm:$0xf] %vm495_vm10, %v506_v17  ;;  %vm789_vm10 = vcmask 31744  }
 0x148   : > { %v511_v20 = vld [vmem:[#allocation2] sm:$0xff] }
 0x149   : > { %v512_v18 = vld [vmem:[#allocation2 + $0x8] sm:$0xff] }
 0x14a   : > { %v513_v22 = vld [vmem:[#allocation2 + $0x10] sm:$0xf] }
 0x14b   : > { %v514_v19 = vld [vmem:[#allocation2 + $0x18] sm:$0xf]  ;;  %v981_v23 = vpack.c.bf16 %v513_v22, %v511_v20 }
 0x14c   : > { %v978_v21 = vpack.c.bf16 %v514_v19, %v512_v18 }
 0x14e   : > { %980 = vmatprep.subr.msk.bf16.mxu0 %vm979_vm8, %v978_v21 }
 0x14f   : > { %983 = vmatpush1.bf16.msk.msra.mxu0 %vm979_vm8, %v981_v23 }
 0x150   : > { %973 = vmatprep.subr.mxu0 %v1162_v56 }
 0x151   : > { %v519_v27 = vpop.permute.xlu1 %518 }
 0x152   : > { %950 = vmatmul.mubr.msk.f32.vlgmr.msra.gmra.mrb[0].mxu0 %vm521_vm9, %v510_v24 }
 0x153   : > { %974 = vmatpush3.msk.msra.mxu0 %vm525_vm6, %v782_v25  ;;  %975 = vmatprep.mubr.msk.f32.mxu0 %vm1166_vm3, %v1162_v56  ;;  %vm616_vm3 = vcmask 261248  }
 0x156   : > { %976 = vmatmul.mubr.msk.f32.vlgmr.msra.gmra.mrb[2].mxu0 %vm789_vm10, %v781_v26 }
 0x225   : > { %v598_v28 = vpop.f32.mrb[0].mxu0 }
 0x226   : > { %v599_v29 = vadd.f32 %v598_v28, %v519_v27  ;;  %v600_v30 = vpop.f32.mrb[1].mxu0 }
 0x227   : > { %v601_v33 = vadd.f32 %v600_v30, %v519_v27 }
 0x228   : > { %v603_v31 = vmax.f32 %v599_v29, 0.0 }
 0x229   : > { %v604_v34 = vmax.f32 %v601_v33, 0.0  ;;  %v1350_v36 = vpop.f32.mrb[2].mxu0 }
 0x22a   : > { %612 = vrot.lane.b32.xlu1 %v603_v31, %s1144_s9  ;;  %608 = vrot.lane.b32.xlu0 %v603_v31, %s1154_s29  ;;  %606 = vst.msk [vmem:[#allocation3] sm:$0xff] %vm605_vm11, %v603_v31  ;;  %s1174_s9 = smov 116   ;;  %s1175_s29 = smov 117   ;;  %v977_v37 = vpop.f32.mrb[3].mxu0 }
 0x22e   : > { %622 = vrot.lane.b32.xlu1 %v603_v31, %s1164_s22  ;;  %618 = vrot.lane.b32.xlu0 %v603_v31, %s1163_s21  ;;  %s1177_s21 = smov 115   ;;  %s1178_s22 = smov 113  }
 0x232   : > { %632 = vrot.lane.b32.xlu1 %v603_v31, %s1168_s17  ;;  %628 = vrot.lane.b32.xlu0 %v603_v31, %s1169_s18 }
 0x236   : > { %642 = vrot.lane.b32.xlu1 %v603_v31, %s1170_s20  ;;  %638 = vrot.lane.b32.xlu0 %v603_v31, %s1171_s23  ;;  %s267_s23 = sand.u32 1, %s1126_s25  }
 0x237   : > { %s870_s15 = scalar_lea.sflag [#allocation5], %s267_s23 }
 0x23a   : > { %652 = vrot.lane.b32.xlu1 %v603_v31, %s1172_s8  ;;  %648 = vrot.lane.b32.xlu0 %v603_v31, %s1173_s13  ;;  %s946_s8 = sshll.u32 %s267_s23, 3  ;;  %s955_s13 = sshll.u32 %s1242_s28, 7 }
 0x23b   : > { %s1180_s28 = smov [#allocation4]  }
 0x23c   : > { %s1076_s17 = sshll.u32 %s1180_s28, 4  ;;  %s1077_s17 = int_to_ptr.vmem [resolvable:$false] %s1076_s17 }
 0x23d   : > { %s1078_s18 = scalar_lea.vmem %s1077_s17, 256 }
 0x23e   : > { %662 = vrot.lane.b32.xlu1 %v603_v31, %s1174_s9  ;;  %658 = vrot.lane.b32.xlu0 %v603_v31, %s1175_s29  ;;  %s269_s9 = scalar_lea.vmem [#allocation4], %s946_s8 }
 0x23f   : > { %s883_s29 = sshll.u32 %s269_s9, 4  ;;  %s1369_s29 = int_to_ptr.vmem [resolvable:$true] %s883_s29 }
 0x240   : > { %s1072_s16 = scalar_lea.vmem %s1369_s29, 128  ;;  %p1079_p0 = scmp.lt.s32.totalorder %s1369_s29, %s1077_s17 }
 0x241   : > { %p1073_p11 = scmp.ne.s32.totalorder %s1369_s29, %s1072_s16  ;;  %p1080_p1 = scmp.lt.s32.totalorder %s1078_s18, %s1072_s16 }
 0x242   : > { %672 = vrot.lane.b32.xlu1 %v603_v31, %s1137_s19  ;;  %668 = vrot.lane.b32.xlu0 %v603_v31, %s1177_s21 }
 0x243   : > { %p1074_p12 = pnand %p1073_p11, %p1259_p5  ;;  %p1081_p2 = por %p1080_p1, %p1079_p0 }
 0x245   : > { %p1075_p13 = pneg %p1074_p12 }
 0x246   : > { %684 = vrot.lane.b32.xlu1 %v603_v31, %s1178_s22  ;;  %677 = vrot.lane.b32.xlu0 %v604_v34, %s1137_s19 }
 0x247   : > { %p1082_p3 = pnand %p1081_p2, %p1075_p13 }
 0x24a   : > { %692 = vrot.lane.b32.xlu1 %v604_v34, %s1179_s14  ;;  %686 = vrot.lane.b32.xlu0 %v604_v34, %s1178_s22  ;;  %s1367_s14 = scalar_lea.hbm %s1416_s7, %s955_s13 }
 0x24e   : > { %786 = vperm.xlu1 %1070, %v783_v35   ;;  %703 = vperm.xlu0 %1071, %v700_v38  }
 0x29c   : > { %v613_v39 = vpop.permute.xlu1 %612  ;;  %v609_v40 = vpop.permute.xlu0 %608 }
 0x29d   : > { %615 = vst.msk [vmem:[#allocation3 + $0x10] sm:$0xff] %vm605_vm11, %v613_v39  ;;  %611 = vst.msk [vmem:[#allocation3 + $0x8] sm:$0xff] %vm605_vm11, %v609_v40 }
 0x29e   : > { %617 = vst.msk [vmem:[#allocation3] sm:$0xff] %vm616_vm3, %v613_v39 }
 0x2a0   : > { %v623_v41 = vpop.permute.xlu1 %622  ;;  %v619_v42 = vpop.permute.xlu0 %618 }
 0x2a1   : > { %625 = vst.msk [vmem:[#allocation3 + $0x10] sm:$0xff] %vm616_vm3, %v623_v41  ;;  %621 = vst.msk [vmem:[#allocation3 + $0x8] sm:$0xff] %vm616_vm3, %v619_v42 }
 0x2a2   : > { %627 = vst.msk [vmem:[#allocation3] sm:$0xff] %vm626_vm12, %v623_v41 }
 0x2a4   : > { %v633_v43 = vpop.permute.xlu1 %632  ;;  %v629_v44 = vpop.permute.xlu0 %628 }
 0x2a5   : > { %635 = vst.msk [vmem:[#allocation3 + $0x10] sm:$0xff] %vm626_vm12, %v633_v43  ;;  %631 = vst.msk [vmem:[#allocation3 + $0x8] sm:$0xff] %vm626_vm12, %v629_v44 }
 0x2a6   : > { %637 = vst.msk [vmem:[#allocation3] sm:$0xff] %vm636_vm13, %v633_v43 }
 0x2a8   : > { %v643_v45 = vpop.permute.xlu1 %642  ;;  %v639_v46 = vpop.permute.xlu0 %638 }
 0x2a9   : > { %645 = vst.msk [vmem:[#allocation3 + $0x10] sm:$0xff] %vm636_vm13, %v643_v45  ;;  %641 = vst.msk [vmem:[#allocation3 + $0x8] sm:$0xff] %vm636_vm13, %v639_v46 }
 0x2aa   : > { %647 = vst.msk [vmem:[#allocation3] sm:$0xff] %vm646_vm14, %v643_v45 }
 0x2ac   : > { %v653_v47 = vpop.permute.xlu1 %652  ;;  %v649_v48 = vpop.permute.xlu0 %648 }
 0x2ad   : > { %655 = vst.msk [vmem:[#allocation3 + $0x10] sm:$0xff] %vm646_vm14, %v653_v47  ;;  %651 = vst.msk [vmem:[#allocation3 + $0x8] sm:$0xff] %vm646_vm14, %v649_v48 }
 0x2ae   : > { %657 = vst.msk [vmem:[#allocation3] sm:$0xff] %vm656_vm15, %v653_v47 }
 0x2b0   : > { %v663_v49 = vpop.permute.xlu1 %662  ;;  %v659_v50 = vpop.permute.xlu0 %658 }
 0x2b1   : > { %665 = vst.msk [vmem:[#allocation3 + $0x10] sm:$0xff] %vm656_vm15, %v663_v49  ;;  %661 = vst.msk [vmem:[#allocation3 + $0x8] sm:$0xff] %vm656_vm15, %v659_v50 }
 0x2b2   : > { %667 = vst.msk [vmem:[#allocation3] sm:$0xff] %vm666_vm0, %v663_v49 }
 0x2b4   : > { %v673_v51 = vpop.permute.xlu1 %672  ;;  %v669_v52 = vpop.permute.xlu0 %668 }
 0x2b5   : > { %675 = vst.msk [vmem:[#allocation3 + $0x10] sm:$0xff] %vm666_vm0, %v673_v51  ;;  %671 = vst.msk [vmem:[#allocation3 + $0x8] sm:$0xff] %vm666_vm0, %v669_v52 }
 0x2b8   : > { %v685_v53 = vpop.permute.xlu1 %684  ;;  %v678_v54 = vpop.permute.xlu0 %677 }
 0x2b9   : > { %v680_v55 = vsel %vm679_vm1, %v673_v51, %v678_v54 }
 0x2ba   : > { %683 = vst.msk [vmem:[#allocation3] sm:$0xff] %vm682_vm2, %v680_v55 }
 0x2bc   : > { %v693_v57 = vpop.permute.xlu1 %692  ;;  %v687_v58 = vpop.permute.xlu0 %686 }
 0x2bd   : > { %695 = vst.msk [vmem:[#allocation3 + $0x10] sm:$0xff] %vm682_vm2, %v693_v57  ;;  %v689_v59 = vsel %vm688_vm4, %v685_v53, %v687_v58 }
 0x2be   : > { %691 = vst.msk [vmem:[#allocation3 + $0x8] sm:$0xff] %vm682_vm2, %v689_v59 }
 0x2c1   : > { %v697_v60 = vld [vmem:[#allocation3] sm:$0xff] }
 0x2c4   : > { %v699_v0 = vld [vmem:[#allocation3 + $0x10] sm:$0xff] }
 0x2c5   : > { %v698_v61 = vld [vmem:[#allocation3 + $0x8] sm:$0xff] }
 0x2c6   : > { %v985_v62 = vpack.c.bf16 %v698_v61, %v697_v60 }
 0x2c8   : > { %986 = vmatpush3.bf16.msra.mxu1 %v985_v62 }
 0x2c9   : > { %968 = vmatprep.subr.mxu1 %v1162_v56 }
 0x2cc   : > { %969 = vmatpush3.msra.mxu1 %v699_v0 }
 0x2cd   : > { %971 = vmatmul.mubr.msk.f32.vlgmr.msra.gmra.mrb[0].mxu1 %vm706_vm5, %v696_v63  ;;  %v704_v1 = vpop.permute.xlu0 %703  ;;  %v787_v2 = vpop.permute.xlu1 %786 }
 0x2ce   : > { %v863_v6 = vadd.f32 %v1350_v36, %v787_v2 }
 0x3a0   : > { %v776_v3 = vpop.f32.mrb[0].mxu1 }
 0x3a1   : > { %v777_v4 = vadd.f32 %v776_v3, %v704_v1  ;;  %v972_v5 = vpop.f32.mrb[1].mxu1 }
 0x3a3   : > { %v780_v7 = vmax.f32 %v777_v4, 0.0 }
 0x3a5   : > { %v866_v56 = vadd.f32 %v863_v6, %v780_v7 }
 0x3a7   : > { %v867_v8 = vmax.f32 %v866_v56, 0.0 }
 0x3a9   : > { %868 = vst [vmem:[%s269_s9] sm:$0xff] %v867_v8 }
 0x3aa   : > { %1085 = shalt.err (!%p1082_p3)
}
 0x3ab   : > { %s1086_s19 = scalar_lea.hbm %s1367_s14, 128  ;;  %s1090_s8 = scalar_lea.hbm %s1416_s7, 256 }
 0x3ac   : > { %p1087_p4 = scmp.ne.s32.totalorder %s1367_s14, %s1086_s19  ;;  %p1091_p9 = scmp.lt.u32.totalorder %s1367_s14, %s1416_s7 }
 0x3ad   : > { %p1092_p10 = scmp.lt.u32.totalorder %s1090_s8, %s1086_s19  ;;  %p1094_p12 = scmp.lt.u32.totalorder %s1086_s19, %s1367_s14 }
 0x3ae   : > { %p1088_p7 = pnand %p1087_p4, %p1259_p5 }
 0x3af   : > { %p1093_p11 = por %p1092_p10, %p1091_p9 }
 0x3b0   : > { %p1089_p8 = pneg %p1088_p7 }
 0x3b1   : > { %p1095_p13 = por %p1094_p12, %p1093_p11 }
 0x3b3   : > { %p1096_p0 = pnand %p1095_p13, %p1089_p8 }
 0x3b5   : > { %1099 = shalt.err (!%p1096_p0)
}
 0x3b6   : > { %987 = dma.vmem_to_hbm [thread:$0]  (%p1259_p5), %s1369_s29, 128, %s1367_s14, %s870_s15  }
 0x3b7 PF: > { %p993_p1 = scmp.ge.s32.totalorder %s1134_s27, 2  ;;  %s895_s21 = sand.u32 1, %s1122_s24  }
 0x3b8   : > { %s896_s22 = scalar_lea.sflag [#allocation5], %s895_s21 }
 0x3b9   : > { %p990_p2 = pnand %p993_p1, %p1263_p6 }
 0x3bb   : > { %1117 = dma.done.wait (!%p990_p2), %s896_s22, 128  }
 0x3bc   : > { %1119 = vsyncadd (!%p990_p2), %s896_s22, 4294967168  ;;  %p17_p3 = scmp.ge.s32.totalorder %s1246_s30, 4   ;;  %s1419_s24 = smov %s1126_s25 }
 0x3bd   : > { %s1420_s25 = smov %s1130_s26  ;;  %s1421_s26 = smov %s1257_s10 }
 0x3be   : > { %s1422_s27 = smov %s1246_s30  ;;  %19 = sbr.rel (!%p17_p3) target bundleno = 3 (0x3), region = 83 }
 0x3c5   :  { %901 = vsyncpa [#allocation5], 1 }
 0x3c6   :  { %903 = vsyncpa [#allocation5 + $0x1], 1 }

</bundles_post_ra>
